<compile_context>
chip_gen: v5e
topology: v5e:2x2
jax: 0.10.0
libtpu: 0.0.40
codegen_flags: <defaults>
</compile_context>

<pallas_src>
import functools

import jax
import jax.numpy as jnp
from jax.experimental import pallas as pl
from jax.experimental.pallas import tpu as pltpu


def _cdiv(a, b):
    return -(-a // b)


def _round_up(n, m):
    return ((n + m - 1) // m) * m


def mlp_kernel(x_ref, w1_ref, b1_ref, w2_ref, b2_ref, w3t_ref, b3_ref, o_ref,
               *, compute_dtype):
    """One batch tile: relu(x@w1+b1) -> relu(.@w2+b2) -> .@w3+b3 (lane-dense out)."""
    # In-kernel cast of the MXU operands (x stays f32 in HBM; no extra HBM pass).
    x = x_ref[...].astype(compute_dtype)
    w1 = w1_ref[...].astype(compute_dtype)

    # hidden: Linear(feaNum, hidNum) + ReLU   (MXU matmul, f32 accumulate)
    h1 = jnp.dot(x, w1, preferred_element_type=jnp.float32)
    h1 = jnp.maximum(h1 + b1_ref[...], 0.0)          # bias + ReLU in f32 (VPU)

    # hidden_2: Linear(hidNum, hidNum_2) + ReLU
    w2 = w2_ref[...].astype(compute_dtype)
    h2 = jnp.dot(h1.astype(compute_dtype), w2, preferred_element_type=jnp.float32)
    h2 = jnp.maximum(h2 + b2_ref[...], 0.0)

    # predict: Linear(hidNum_2, outNum), no activation.
    out_num = o_ref.shape[0]                           # o_ref: (outNum, TB)
    if out_num == 1:
        # 1-column output: an MXU pass would do only hidNum_2 MACs per row.
        # Use the otherwise-idle VPU multiply + XLU lane-reduce, all in f32
        # (w3t is consumed in f32; it never sees bf16 rounding).
        out = jnp.sum(h2 * w3t_ref[...], axis=-1, keepdims=True)   # (TB, 1)
    else:
        # w3t is [outNum, hidNum_2]; contract both operands on their dim 1.
        out = jax.lax.dot_general(
            h2.astype(compute_dtype), w3t_ref[...].astype(compute_dtype),
            dimension_numbers=(((1,), (1,)), ((), ())),
            preferred_element_type=jnp.float32)                    # (TB, outNum)
    out = out + b3_ref[...]

    # Lane-dense store: put the batch rows on the lane axis (sublane->lane
    # transpose on the XLU) so the store is an unmasked, dense vst.
    o_ref[...] = jnp.transpose(out).astype(o_ref.dtype)            # (outNum, TB)


@functools.partial(jax.jit, static_argnames=("block_batch", "compute_dtype"))
def net_forward(x, w1, b1, w2, b2, w3t, b3, *, block_batch=2048,
                compute_dtype=jnp.bfloat16):
    batch, fea = x.shape
    out_num = w3t.shape[0]

    # ---- tile selection -----------------------------------------------------
    # Minimize zero-padding: pick the number of tiles first, then size each
    # tile to cover the batch (pad <= 8 rows per tile).  When splitting, use an
    # even tile count so v7x's 2 TensorCores get equal work.
    n_tiles = max(1, _cdiv(batch, block_batch))
    if n_tiles == 1:
        if batch >= 1024:          # big enough that 2 tiles beat per-step overhead
            n_tiles = 2
    elif n_tiles % 2:
        n_tiles += 1
    tb = max(8, _round_up(_cdiv(batch, n_tiles), 8))
    padded_batch = n_tiles * tb

    if padded_batch != batch:      # pad only when needed; rows are sliced off below
        x = jnp.pad(x, ((0, padded_batch - batch), (0, 0)))

    grid = (n_tiles,)

    def resident(shape):           # constant block index -> stays in VMEM
        return pl.BlockSpec(shape, lambda i: (0,) * len(shape))

    flops = 2 * padded_batch * (fea * w1.shape[1]
                                + w1.shape[1] * w2.shape[1]
                                + w2.shape[1] * out_num)
    param_bytes = sum(int(a.size) * a.dtype.itemsize
                      for a in (w1, b1, w2, b2, w3t, b3))
    bytes_accessed = (padded_batch * fea * x.dtype.itemsize
                      + padded_batch * out_num * 4
                      + param_bytes)

    out = pl.pallas_call(
        functools.partial(mlp_kernel, compute_dtype=compute_dtype),
        # Output is (n_tiles, outNum, TB): batch sits on the lane axis so every
        # grid step does a lane-dense store.
        out_shape=jax.ShapeDtypeStruct((n_tiles, out_num, tb), jnp.float32),
        grid=grid,
        in_specs=[
            pl.BlockSpec((tb, fea), lambda i: (i, 0)),
            resident(w1.shape), resident(b1.shape),
            resident(w2.shape), resident(b2.shape),
            resident(w3t.shape), resident(b3.shape),
        ],
        out_specs=pl.BlockSpec((None, out_num, tb), lambda i: (i, 0, 0)),
        compiler_params=pltpu.CompilerParams(
            dimension_semantics=("parallel",)),
        cost_estimate=pl.CostEstimate(
            flops=flops, transcendentals=0, bytes_accessed=bytes_accessed),
    )(x, w1, b1, w2, b2, w3t, b3)

    # (n_tiles, outNum, TB) -> (padded_batch, outNum) -> drop padded rows.
    out = jnp.moveaxis(out, 1, 2).reshape(padded_batch, out_num)
    return out[:batch]


def init_linear(key, fan_in, fan_out):
    # Mimics PyTorch nn.Linear default init: U(-1/sqrt(fan_in), 1/sqrt(fan_in)).
    kw, kb = jax.random.split(key)
    bound = 1.0 / jnp.sqrt(fan_in)
    w = jax.random.uniform(kw, (fan_in, fan_out), jnp.float32, -bound, bound)
    b = jax.random.uniform(kb, (1, fan_out), jnp.float32, -bound, bound)
    return w, b


def _reference(x, w1, b1, w2, b2, w3, b3):
    h = jnp.maximum(x @ w1 + b1, 0.0)
    h = jnp.maximum(h @ w2 + b2, 0.0)
    return h @ w3 + b3


if __name__ == "__main__":
    # Boston Housing style sizes, kept small.
    batch, fea_num, hid_num, hid_num_2, out_num = 8, 13, 32, 16, 1

    key = jax.random.PRNGKey(0)
    kx, k1, k2, k3 = jax.random.split(key, 4)

    x = jax.random.normal(kx, (batch, fea_num), jnp.float32)
    w1, b1 = init_linear(k1, fea_num, hid_num)
    w2, b2 = init_linear(k2, hid_num, hid_num_2)
    w3, b3 = init_linear(k3, hid_num_2, out_num)
    w3t = w3.T  # last layer kept in PyTorch nn.Linear layout [out, in]

    ref = _reference(x, w1, b1, w2, b2, w3, b3)

    # Exact check with f32 MXU compute (single grid step).
    y32 = net_forward(x, w1, b1, w2, b2, w3t, b3, compute_dtype=jnp.float32)
    jax.block_until_ready(y32)
    assert y32.shape == (batch, out_num)
    assert jnp.allclose(y32, ref, atol=1e-5, rtol=1e-5)

    # Default bf16-MXU path (f32 accumulation), looser tolerance.
    y16 = net_forward(x, w1, b1, w2, b2, w3t, b3)
    jax.block_until_ready(y16)
    assert y16.shape == (batch, out_num)
    assert jnp.allclose(y16, ref, atol=5e-2, rtol=5e-2)

    # Multi-tile run: odd tile count bumped to even (v7x megacore), padding
    # kept to <= 8 rows per tile, and batch padding path exercised.
    big_batch = 600
    xb = jax.random.normal(jax.random.PRNGKey(1), (big_batch, fea_num),
                           jnp.float32)
    yb = net_forward(xb, w1, b1, w2, b2, w3t, b3, block_batch=256,
                     compute_dtype=jnp.float32)
    jax.block_until_ready(yb)
    refb = _reference(xb, w1, b1, w2, b2, w3, b3)
    assert yb.shape == (big_batch, out_num)
    assert jnp.allclose(yb, refb, atol=1e-5, rtol=1e-5)

    print("KERNEL_OK")
</pallas_src>

<mosaic_0001>
module attributes {stable_mosaic.version = 11 : i64} {
  func.func @mlp_kernel(%arg0: i32, %arg1: memref<8x13xf32, #tpu.memory_space<vmem>>, %arg2: memref<13x32xf32, #tpu.memory_space<vmem>>, %arg3: memref<1x32xf32, #tpu.memory_space<vmem>>, %arg4: memref<32x16xf32, #tpu.memory_space<vmem>>, %arg5: memref<1x16xf32, #tpu.memory_space<vmem>>, %arg6: memref<1x16xf32, #tpu.memory_space<vmem>>, %arg7: memref<1x1xf32, #tpu.memory_space<vmem>>, %arg8: memref<1x1x8xf32, #tpu.memory_space<vmem>>) attributes {dimension_semantics = [#tpu.dimension_semantics<parallel>], iteration_bounds = array<i64: 1>, scalar_prefetch = 0 : i64, scratch_operands = 0 : i64, tpu.core_type = #tpu.core_type<tc>, window_params = [{transform_indices = @transform_0, window_bounds = array<i64: 8, 13>}, {pipeline_mode = #tpu.pipeline_mode<synchronous>, transform_indices = @transform_1, window_bounds = array<i64: 13, 32>}, {pipeline_mode = #tpu.pipeline_mode<synchronous>, transform_indices = @transform_2, window_bounds = array<i64: 1, 32>}, {pipeline_mode = #tpu.pipeline_mode<synchronous>, transform_indices = @transform_3, window_bounds = array<i64: 32, 16>}, {pipeline_mode = #tpu.pipeline_mode<synchronous>, transform_indices = @transform_4, window_bounds = array<i64: 1, 16>}, {pipeline_mode = #tpu.pipeline_mode<synchronous>, transform_indices = @transform_5, window_bounds = array<i64: 1, 16>}, {pipeline_mode = #tpu.pipeline_mode<synchronous>, transform_indices = @transform_6, window_bounds = array<i64: 1, 1>}, {transform_indices = @transform_7, window_bounds = array<i64: 1, 1, 8>}]} {
    %c0 = arith.constant 0 : index
    %c0_0 = arith.constant 0 : index
    %0 = vector.load %arg1[%c0, %c0_0] : memref<8x13xf32, #tpu.memory_space<vmem>>, vector<8x13xf32>
    %c0_1 = arith.constant 0 : index
    %c0_2 = arith.constant 0 : index
    %1 = vector.load %arg2[%c0_1, %c0_2] : memref<13x32xf32, #tpu.memory_space<vmem>>, vector<13x32xf32>
    %cst = arith.constant dense<0.000000e+00> : vector<8x32xf32>
    %2 = tpu.matmul %0, %1, %cst {dimension_numbers = #tpu.dot_dimension_numbers<[1], [0], [0], [1], [0, 0, 1, 1], [], []>} : vector<8x13xf32>, vector<13x32xf32>, vector<8x32xf32> -> vector<8x32xf32>
    %c0_3 = arith.constant 0 : index
    %c0_4 = arith.constant 0 : index
    %3 = vector.load %arg3[%c0_3, %c0_4] : memref<1x32xf32, #tpu.memory_space<vmem>>, vector<1x32xf32>
    %4 = vector.broadcast %3 : vector<1x32xf32> to vector<8x32xf32>
    %5 = arith.addf %2, %4 : vector<8x32xf32>
    %cst_5 = arith.constant 0.000000e+00 : f32
    %6 = vector.broadcast %cst_5 : f32 to vector<8x32xf32>
    %7 = arith.maximumf %5, %6 : vector<8x32xf32>
    %c0_6 = arith.constant 0 : index
    %c0_7 = arith.constant 0 : index
    %8 = vector.load %arg4[%c0_6, %c0_7] : memref<32x16xf32, #tpu.memory_space<vmem>>, vector<32x16xf32>
    %cst_8 = arith.constant dense<0.000000e+00> : vector<8x16xf32>
    %9 = tpu.matmul %7, %8, %cst_8 {dimension_numbers = #tpu.dot_dimension_numbers<[1], [0], [0], [1], [0, 0, 1, 1], [], []>} : vector<8x32xf32>, vector<32x16xf32>, vector<8x16xf32> -> vector<8x16xf32>
    %c0_9 = arith.constant 0 : index
    %c0_10 = arith.constant 0 : index
    %10 = vector.load %arg5[%c0_9, %c0_10] : memref<1x16xf32, #tpu.memory_space<vmem>>, vector<1x16xf32>
    %11 = vector.broadcast %10 : vector<1x16xf32> to vector<8x16xf32>
    %12 = arith.addf %9, %11 : vector<8x16xf32>
    %cst_11 = arith.constant 0.000000e+00 : f32
    %13 = vector.broadcast %cst_11 : f32 to vector<8x16xf32>
    %14 = arith.maximumf %12, %13 : vector<8x16xf32>
    %c0_12 = arith.constant 0 : index
    %c0_13 = arith.constant 0 : index
    %15 = vector.load %arg6[%c0_12, %c0_13] : memref<1x16xf32, #tpu.memory_space<vmem>>, vector<1x16xf32>
    %16 = vector.broadcast %15 : vector<1x16xf32> to vector<8x16xf32>
    %17 = arith.mulf %14, %16 : vector<8x16xf32>
    %cst_14 = arith.constant dense<0.000000e+00> : vector<8xf32>
    %18 = vector.multi_reduction <add>, %17, %cst_14 [1] : vector<8x16xf32> to vector<8xf32>
    %19 = vector.shape_cast %18 : vector<8xf32> to vector<8x1xf32>
    %c0_15 = arith.constant 0 : index
    %c0_16 = arith.constant 0 : index
    %20 = vector.load %arg7[%c0_15, %c0_16] : memref<1x1xf32, #tpu.memory_space<vmem>>, vector<1x1xf32>
    %21 = vector.broadcast %20 : vector<1x1xf32> to vector<8x1xf32>
    %22 = arith.addf %19, %21 : vector<8x1xf32>
    %23 = tpu.transpose %22, [1, 0] : vector<8x1xf32> -> vector<1x8xf32>
    %c0_17 = arith.constant 0 : index
    %c0_18 = arith.constant 0 : index
    %c0_19 = arith.constant 0 : index
    %24 = vector.load %arg8[%c0_17, %c0_18, %c0_19] : memref<1x1x8xf32, #tpu.memory_space<vmem>>, vector<1x1x8xf32>
    %25 = vector.shape_cast %24 : vector<1x1x8xf32> to vector<1x8xf32>
    %26 = vector.shape_cast %23 : vector<1x8xf32> to vector<1x1x8xf32>
    tpu.vector_store %arg8[%c0_17, %c0_18, %c0_19], %26 {strides = array<i32>} : memref<1x1x8xf32, #tpu.memory_space<vmem>>, vector<1x1x8xf32>,
    return
  }
  func.func @transform_0(%arg0: i32) -> (i32, i32) {
    %c0_i32 = arith.constant 0 : i32
    %c0_i32_0 = arith.constant 0 : i32
    return %arg0, %c0_i32 : i32, i32
  }
  func.func @transform_1(%arg0: i32) -> (i32, i32) {
    %c0_i32 = arith.constant 0 : i32
    %c0_i32_0 = arith.constant 0 : i32
    %c0_i32_1 = arith.constant 0 : i32
    return %c0_i32, %c0_i32_0 : i32, i32
  }
  func.func @transform_2(%arg0: i32) -> (i32, i32) {
    %c0_i32 = arith.constant 0 : i32
    %c0_i32_0 = arith.constant 0 : i32
    %c0_i32_1 = arith.constant 0 : i32
    return %c0_i32, %c0_i32_0 : i32, i32
  }
  func.func @transform_3(%arg0: i32) -> (i32, i32) {
    %c0_i32 = arith.constant 0 : i32
    %c0_i32_0 = arith.constant 0 : i32
    %c0_i32_1 = arith.constant 0 : i32
    return %c0_i32, %c0_i32_0 : i32, i32
  }
  func.func @transform_4(%arg0: i32) -> (i32, i32) {
    %c0_i32 = arith.constant 0 : i32
    %c0_i32_0 = arith.constant 0 : i32
    %c0_i32_1 = arith.constant 0 : i32
    return %c0_i32, %c0_i32_0 : i32, i32
  }
  func.func @transform_5(%arg0: i32) -> (i32, i32) {
    %c0_i32 = arith.constant 0 : i32
    %c0_i32_0 = arith.constant 0 : i32
    %c0_i32_1 = arith.constant 0 : i32
    return %c0_i32, %c0_i32_0 : i32, i32
  }
  func.func @transform_6(%arg0: i32) -> (i32, i32) {
    %c0_i32 = arith.constant 0 : i32
    %c0_i32_0 = arith.constant 0 : i32
    %c0_i32_1 = arith.constant 0 : i32
    return %c0_i32, %c0_i32_0 : i32, i32
  }
  func.func @transform_7(%arg0: i32) -> (i32, i32, i32) {
    %c0_i32 = arith.constant 0 : i32
    %c0_i32_0 = arith.constant 0 : i32
    %c0_i32_1 = arith.constant 0 : i32
    return %arg0, %c0_i32, %c0_i32_0 : i32, i32, i32
  }
}

</mosaic_0001>

<bundles_post_ra>
// kernel: net_forward.1
= control target key start
LH: loop header
LB: loop body
LE: loop exit
PB: predicated region body
PF: predicated region fallthrough
CT: control target
= control target key end

     0   :  { %s274_s0 = inlined_call_operand.vmem [shape: f32[8,13], index: 0, kind: input, shape index: {}]   ;;  %s275_s1 = inlined_call_operand.vmem [shape: f32[13,32], index: 1, kind: input, shape index: {}]   ;;  %s276_s2 = inlined_call_operand.vmem [shape: f32[1,32], index: 2, kind: input, shape index: {}]   ;;  %s277_s3 = inlined_call_operand.vmem [shape: f32[32,16], index: 3, kind: input, shape index: {}]   ;;  %s278_s4 = inlined_call_operand.vmem [shape: f32[1,16], index: 4, kind: input, shape index: {}]   ;;  %s279_s5 = inlined_call_operand.vmem [shape: f32[1,16], index: 5, kind: input, shape index: {}]   ;;  %s280_s6 = inlined_call_operand.<no memory space> [shape: f32[1,1], index: 6, kind: input, shape index: {}]   ;;  %s281_s7 = inlined_call_operand.hbm [shape: f32[1,1,8], index: 7, kind: output, shape index: {}]  }
   0x1   :  { %v12_v0 = vstv %s280_s6 }
   0x2   :  { %13 = vst [vmem:[#allocation2] sm:$0x1] %v12_v0 }
   0x3   :  { %v31_v1 = vld [vmem:[%s275_s1 + $0x8] sm:$0x1f]  ;;  %vm40_vm0 = vcmask 1044480   ;;  %v30_v2 = vld [vmem:[%s275_s1] sm:$0xff]  ;;  %vm36_vm1 = vcmask 105472   ;;  %v68_v4 = vld [vmem:[%s277_s3 + $0x18] sm:$0xff] }
   0x4   :  { %162 = vmatpush.msk.msra.mxu0 %vm40_vm0, %v31_v1  ;;  %v29_v3 = vld [vmem:[%s274_s0] sm:$0xff]  ;;  %89 = vmatpush.msra.mxu1 %v68_v4 }
   0x6   :  { %59 = vmatpush.msra.mxu0 %v30_v2 }
   0x7   :  { %14 = vsyncpa [#allocation4], 0  ;;  %163 = vmatmul.msk.f32.vlgmr.msra.gmra.mxu0 %vm36_vm1, %v29_v3  ;;  %v67_v5 = vld [vmem:[%s277_s3 + $0x10] sm:$0xff]  ;;  %v66_v6 = vld [vmem:[%s277_s3 + $0x8] sm:$0xff]  ;;  %vm73_vm2 = vcmask 261120   ;;  %vm103_vm3 = vcmask 130048  }
   0x8   :  { %90 = vmatpush.msra.mxu1 %v67_v5  ;;  %v65_v7 = vld [vmem:[%s277_s3] sm:$0xff]  ;;  %vm144_vm4 = vcmask 57344  }
   0x9   :  { %v167_v8 = vld [vmem:[%s276_s2] ss:$0 sm:$0xff]  ;;  %s197_s2 = smov [#allocation3]  }
   0xa   :  { %91 = vmatpush.msra.mxu1 %v66_v6  ;;  %v168_v12 = vld [vmem:[%s278_s4] ss:$0 sm:$0xff]  ;;  %s151_s3 = sshll.u32 %s197_s2, 4  ;;  %s153_s4 = sshll.u32 %s281_s7, 4  ;;  %s152_s3 = int_to_ptr.vmem [resolvable:$true] %s151_s3  ;;  %s154_s4 = int_to_ptr.hbm [resolvable:$true] %s153_s4 }
   0xb   :  { %v169_v15 = vld [vmem:[%s279_s5] ss:$0 sm:$0xff] }
   0xc   :  { %92 = vmatpush.msra.mxu1 %v65_v7  ;;  %v170_v19 = vld [vmem:[#allocation2] ss:$0 sm:$0xff] }
  0x84   :  { %v61_v9 = vpop.f32.mrf.mxu0 }
  0x85   :  { %v62_v10 = vadd.f32 %v167_v8, %v61_v9 }
  0x87   :  { %v64_v11 = vmax.f32 %v62_v10, 0.0 }
  0x89   :  { %164 = vmatmul.msk.f32.vlgmr.msra.gmra.mxu1 %vm73_vm2, %v64_v11 }
 0x106   :  { %v94_v13 = vpop.f32.mrf.mxu1 }
 0x107   :  { %v95_v14 = vadd.f32 %v168_v12, %v94_v13 }
 0x109   :  { %v97_v16 = vmax.f32 %v95_v14, 0.0 }
 0x10b   :  { %v102_v17 = vmul.f32 %v169_v15, %v97_v16 }
 0x10d   :  { %v104_v18 = vsel %vm103_vm3, %v102_v17, 0.0 }
 0x10e   :  { %105 = vadd.xlane.f32.xlu0 %v104_v18 }
 0x181   :  { %v106_v20 = vpop.xlane.xlu0 %105 }
 0x182   :  { %v111_v21 = vadd.f32 %v170_v19, %v106_v20 }
 0x184   :  { %112 = vxpose.xlu0.b32.start.end [1/1] (short) (narrow) %v111_v21, 8 }
 0x228   :  { %v128_v22 = vpop.trf.xlu0 }
 0x229   :  { %145 = vst.msk [vmem:[#allocation3] sm:$0x1] %vm144_vm4, %v128_v22 }
 0x22a   :  { %156 = dma.vmem_to_hbm [thread:$0]  %s152_s3, 16, %s154_s4, [#allocation4]  }
 0x22b   :  { %195 = dma.done.wait [#allocation4], 16  }
 0x22c   :  { %196 = vsyncadd [#allocation4], 4294967280 }
 0x22d   :  { %161 = vsyncpa [#allocation4], 1 }

</bundles_post_ra>
